<compile_context>
chip_gen: v7x
topology: tpu7x:2x2x1
jax: 0.10.0
libtpu: 0.0.40
codegen_flags: <defaults>
</compile_context>

<pallas_src>
import jax
import jax.numpy as jnp
from jax.experimental import pallas as pl
from jax.experimental.pallas import tpu as pltpu


def hybrid_quantum_kernel(theta_ref, out_ref):
    # theta_ref: (1, 3) float32 in VMEM — exactly the row the reference
    # consumes (quantum_circuit.run(input[0])).
    theta = theta_ref[...]                  # (1, 3)
    s = jnp.sin(theta)
    p0 = (1.0 - s) * 0.5                    # P(qubit_j measured as 0)
    p1 = (1.0 + s) * 0.5                    # P(qubit_j measured as 1)

    # prod_{k != j} p0[k] from three tiny static lane slices.  At 3 logical
    # lanes these compile to a handful of lane selects on otherwise-idle
    # XLU/VPU slots; pltpu.roll would need masking of the padded lanes for
    # zero wall-clock gain, so the static-slice + concat form is kept.
    p0a, p0b, p0c = p0[:, 0:1], p0[:, 1:2], p0[:, 2:3]
    cross = jnp.concatenate([p0b * p0c, p0a * p0c, p0a * p0b], axis=1)  # (1,3)

    # Qiskit bit ordering: rightmost bit is qubit 0 -> ['001', '010', '100']
    e = p1 * cross                          # unnormalized probabilities (1, 3)

    total = jnp.sum(e, axis=1, keepdims=True)
    total = jnp.maximum(total, jnp.float32(1e-30))   # guard: all thetas ~ -pi/2
    # Exact reciprocal + multiply (shorter than a divide; EUP slot is idle).
    inv = pl.reciprocal(total, approx=False)
    out_ref[0] = e * inv                    # out_ref is (1, 1, 3); [0] -> (1, 3)


@jax.jit
def hybrid_forward(x):
    """x: (batch, 3) rotation angles. Returns (1, 1, 3) float32, like the
    PyTorch Hybrid module (which only uses x[0])."""
    # Slice row 0 *before* the cast and the pallas_call: only 12 bytes are
    # converted and DMA'd into VMEM, independent of the batch size.  XLA fuses
    # this slice+convert for free.
    theta0 = x[:1, :].astype(jnp.float32)   # (1, 3)
    return pl.pallas_call(
        hybrid_quantum_kernel,
        out_shape=jax.ShapeDtypeStruct((1, 1, 3), jnp.float32),
        in_specs=[pl.BlockSpec(memory_space=pltpu.MemorySpace.VMEM)],
        out_specs=pl.BlockSpec(memory_space=pltpu.MemorySpace.VMEM),
        cost_estimate=pl.CostEstimate(
            flops=32, transcendentals=3, bytes_accessed=24),
    )(theta0)


if __name__ == "__main__":
    key = jax.random.PRNGKey(0)
    # batch of 2 theta-vectors (3 angles each); only row 0 is consumed,
    # mirroring HybridFunction.forward.
    x = jax.random.uniform(
        key, (2, 3), dtype=jnp.float32, minval=-jnp.pi, maxval=jnp.pi
    )

    out = jax.block_until_ready(hybrid_forward(x))

    # sanity check against the closed-form reference computed in plain JAX
    th = x[0]
    s = jnp.sin(th)
    p0 = (1.0 - s) * 0.5
    p1 = (1.0 + s) * 0.5
    ref = jnp.stack(
        [p1[0] * p0[1] * p0[2], p0[0] * p1[1] * p0[2], p0[0] * p0[1] * p1[2]]
    )
    ref = (ref / ref.sum()).reshape(1, 1, 3)

    assert out.shape == (1, 1, 3)
    assert jnp.allclose(out, ref, atol=1e-5), (out, ref)
    assert jnp.allclose(out.sum(), 1.0, atol=1e-5)

    print("KERNEL_OK")
</pallas_src>

<mosaic_0001>
module attributes {stable_mosaic.version = 11 : i64} {
  func.func @hybrid_quantum_kernel(%arg0: memref<1x3xf32, #tpu.memory_space<vmem>>, %arg1: memref<1x1x3xf32, #tpu.memory_space<vmem>>) attributes {dimension_semantics = [], scalar_prefetch = 0 : i64, scratch_operands = 0 : i64, tpu.core_type = #tpu.core_type<tc>} {
    %c0 = arith.constant 0 : index
    %c0_0 = arith.constant 0 : index
    %0 = vector.load %arg0[%c0, %c0_0] : memref<1x3xf32, #tpu.memory_space<vmem>>, vector<1x3xf32>
    %1 = math.sin %0 : vector<1x3xf32>
    %cst = arith.constant 1.000000e+00 : f32
    %2 = vector.broadcast %cst : f32 to vector<1x3xf32>
    %3 = arith.subf %2, %1 : vector<1x3xf32>
    %cst_1 = arith.constant 5.000000e-01 : f32
    %4 = vector.broadcast %cst_1 : f32 to vector<1x3xf32>
    %5 = arith.mulf %3, %4 : vector<1x3xf32>
    %cst_2 = arith.constant 1.000000e+00 : f32
    %6 = vector.broadcast %cst_2 : f32 to vector<1x3xf32>
    %7 = arith.addf %6, %1 : vector<1x3xf32>
    %cst_3 = arith.constant 5.000000e-01 : f32
    %8 = vector.broadcast %cst_3 : f32 to vector<1x3xf32>
    %9 = arith.mulf %7, %8 : vector<1x3xf32>
    %10 = vector.extract_strided_slice %5 {offsets = [0, 0], sizes = [1, 1], strides = [1, 1]} : vector<1x3xf32> to vector<1x1xf32>
    %11 = vector.extract_strided_slice %5 {offsets = [0, 1], sizes = [1, 1], strides = [1, 1]} : vector<1x3xf32> to vector<1x1xf32>
    %12 = vector.extract_strided_slice %5 {offsets = [0, 2], sizes = [1, 1], strides = [1, 1]} : vector<1x3xf32> to vector<1x1xf32>
    %13 = arith.mulf %11, %12 : vector<1x1xf32>
    %14 = arith.mulf %10, %12 : vector<1x1xf32>
    %15 = arith.mulf %10, %11 : vector<1x1xf32>
    %16 = tpu.concatenate %13, %14, %15 in 1 : vector<1x1xf32>, vector<1x1xf32>, vector<1x1xf32> -> vector<1x3xf32>
    %17 = arith.mulf %9, %16 : vector<1x3xf32>
    %cst_4 = arith.constant dense<0.000000e+00> : vector<1xf32>
    %18 = vector.multi_reduction <add>, %17, %cst_4 [1] : vector<1x3xf32> to vector<1xf32>
    %19 = vector.shape_cast %18 : vector<1xf32> to vector<1x1xf32>
    %cst_5 = arith.constant 1.000000e-30 : f32
    %20 = vector.broadcast %cst_5 : f32 to vector<1x1xf32>
    %21 = arith.maximumf %19, %20 : vector<1x1xf32>
    %22 = tpu.reciprocal %21 : vector<1x1xf32> -> vector<1x1xf32>
    %23 = vector.broadcast %22 : vector<1x1xf32> to vector<1x3xf32>
    %24 = arith.mulf %17, %23 : vector<1x3xf32>
    %c0_6 = arith.constant 0 : index
    %c0_7 = arith.constant 0 : index
    %c0_8 = arith.constant 0 : index
    %25 = vector.load %arg1[%c0_6, %c0_7, %c0_8] : memref<1x1x3xf32, #tpu.memory_space<vmem>>, vector<1x1x3xf32>
    %26 = vector.shape_cast %25 : vector<1x1x3xf32> to vector<1x3xf32>
    %27 = vector.shape_cast %24 : vector<1x3xf32> to vector<1x1x3xf32>
    tpu.vector_store %arg1[%c0_6, %c0_7, %c0_8], %27 {strides = array<i32>} : memref<1x1x3xf32, #tpu.memory_space<vmem>>, vector<1x1x3xf32>,
    return
  }
}

</mosaic_0001>

<bundles_post_ra>
// kernel: hybrid_forward.1
= control target key start
LH: loop header
LB: loop body
LE: loop exit
PB: predicated region body
PF: predicated region fallthrough
CT: control target
= control target key end

     0   :  { %s279_s0 = inlined_call_operand.vmem [shape: f32[1,3], index: 0, kind: input, shape index: {}]   ;;  %s280_s1 = inlined_call_operand.hbm [shape: f32[1,1,3], index: 1, kind: output, shape index: {}]  }
   0x1   :  { %v246_v0 = vld [vmem:[%s279_s0] sm:$0x1] }
   0x2   :  { %v13_v1 = vand.u32 2139095040, %v246_v0  ;;  %v10_v3 = vand.u32 2147483647, %v246_v0 }
   0x4   :  { %v14_v2 = vshrl.u32 %v13_v1, 23 }
   0x5   :  { %6 = vsyncpa [#allocation3], 0  ;;  %v17_v6 = vand.u32 8388607, %v10_v3  ;;  %v222_v12 = vmov 683565275   ;;  %vm102_vm12 = vweird.f32 %v246_v0 }
   0x6   :  { %v173_v4 = vadd.s32 4294967169, %v14_v2  ;;  %v223_v14 = vmov 2475754826   ;;  %v224_v16 = vmov 2131351028   ;;  %vm12_vm7 = vcmp.lt.s32.totalorder %v246_v0, 0 }
   0x7   :  { %v18_v9 = vor.u32 8388608, %v17_v6  ;;  %v225_v18 = vmov 2102212464   ;;  %v226_v20 = vmov 920167782   ;;  %s228_s0 = smov 127  }
   0x8   :  { %v20_v5 = vadd.s32 1, %v173_v4  ;;  %v227_v27 = vmov 1326507024   ;;  %vm11_vm8 = vcmp.le.f32.partialorder %v10_v3, 0.7853982  ;;  %s229_s8 = smov 126  }
   0x9   :  { %v58_v29 = vshll.u32 %v18_v9, 8  ;;  %s230_s9 = smov 2   ;;  %s231_s10 = smov 1   ;;  %vm146_vm13 = vcmask 7168   ;;  %vm148_vm14 = vcmask 15360   ;;  %vm151_vm15 = vcmask 16384  }
   0xa   :  { %vm21_vm0 = vcmp.gt.s32.totalorder %v20_v5, 0  ;;  %s232_s11 = smov [#allocation2]  }
   0xb   :  { %v22_v7 = vsel %vm21_vm0, %v20_v5, 0  ;;  %s165_s12 = sshll.u32 %s232_s11, 4  ;;  %s166_s12 = int_to_ptr.vmem [resolvable:$true] %s165_s12 }
   0xc   :  { %v24_v8 = vand.u32 31, %v22_v7  ;;  %v23_v10 = vshrl.u32 %v22_v7, 5  ;;  %s198_s13 = scalar_lea.vmem %s166_s12, 16  ;;  %s202_s14 = scalar_lea.vmem %s166_s12, 32 }
   0xd   :  { %p199_p0 = scmp.ne.s32.totalorder %s166_s12, %s198_s13  ;;  %p203_p1 = scmp.lt.s32.totalorder %s166_s12, %s166_s12 }
   0xe   :  { %v25_v11 = vsub.s32 32, %v24_v8  ;;  %v27_v13 = vshll.u32 %v222_v12, %v24_v8  ;;  %v30_v15 = vshll.u32 %v223_v14, %v24_v8  ;;  %v33_v17 = vshll.u32 %v224_v16, %v24_v8  ;;  %p204_p2 = scmp.lt.s32.totalorder %s202_s14, %s198_s13 }
   0xf   :  { %v36_v19 = vshll.u32 %v225_v18, %v24_v8  ;;  %v39_v21 = vshll.u32 %v226_v20, %v24_v8  ;;  %vm42_vm1 = vcmp.lt.s32.totalorder %v23_v10, 1  ;;  %vm45_vm2 = vcmp.lt.s32.totalorder %v23_v10, 4 }
  0x10   :  { %v26_v22 = vshrl.u32 %v222_v12, %v25_v11  ;;  %v28_v23 = vshrl.u32 %v223_v14, %v25_v11  ;;  %v31_v24 = vshrl.u32 %v224_v16, %v25_v11  ;;  %v34_v25 = vshrl.u32 %v225_v18, %v25_v11  ;;  %p205_p3 = por %p204_p2, %p203_p1 }
  0x11   :  { %v37_v26 = vshrl.u32 %v226_v20, %v25_v11  ;;  %v40_v28 = vshrl.u32 %v227_v27, %v25_v11  ;;  %vm43_vm3 = vcmp.lt.s32.totalorder %v23_v10, 2  ;;  %vm44_vm4 = vcmp.lt.s32.totalorder %v23_v10, 3 }
  0x12   :  { %v29_v30 = vor.u32 %v28_v23, %v27_v13  ;;  %v32_v31 = vor.u32 %v31_v24, %v30_v15  ;;  %v35_v32 = vor.u32 %v34_v25, %v33_v17  ;;  %p206_p4 = pnand %p205_p3, %p199_p0 }
  0x13   :  { %v38_v33 = vor.u32 %v37_v26, %v36_v19  ;;  %v41_v34 = vor.u32 %v40_v28, %v39_v21 }
  0x14   :  { %v46_v35 = vsel %vm42_vm1, %v26_v22, %v29_v30  ;;  %v47_v36 = vsel %vm45_vm2, %v35_v32, 2102212464  ;;  %v50_v37 = vsel %vm42_vm1, %v29_v30, %v32_v31  ;;  %v54_v38 = vsel %vm42_vm1, %v32_v31, %v35_v32 }
  0x15   :  { %v48_v39 = vsel %vm44_vm4, %v32_v31, %v47_v36  ;;  %v51_v40 = vsel %vm45_vm2, %v38_v33, 920167782  ;;  %v55_v41 = vsel %vm45_vm2, %v41_v34, 1326507024  ;;  %v128_v31 = vlaneseq }
  0x16   :  { %v52_v42 = vsel %vm44_vm4, %v35_v32, %v51_v40  ;;  %v56_v43 = vsel %vm44_vm4, %v38_v33, %v55_v41  ;;  %v49_v44 = vsel %vm43_vm3, %v46_v35, %v48_v39 }
  0x17   :  { %v53_v45 = vsel %vm43_vm3, %v50_v37, %v52_v42  ;;  %v57_v46 = vsel %vm43_vm3, %v54_v38, %v56_v43  ;;  %v65_v51 = vmul.u32 %v58_v29, %v49_v44  ;;  %v129_v32 = vshrl.u32 %v128_v31, 7 }
  0x18   :  { %v252_v47 = vmul.u32.u64.low %v58_v29, %v57_v46  ;;  %v253_v48 = vmul.u32.u64.high %v58_v29, %v57_v46, %v252_v47  ;;  %v255_v49 = vmul.u32.u64.low %v58_v29, %v53_v45  ;;  %v256_v50 = vmul.u32.u64.high %v58_v29, %v53_v45, %v255_v49 }
  0x19   :  { %v130_v33 = vsub.s32 0, %v129_v32 }
  0x1a   :  { %vm67_vm5 = vc.u32 %v253_v48, %v255_v49  ;;  %v68_v52 = vadd.s32 1, %v256_v50  ;;  %v66_v63 = vadd.s32 %v255_v49, %v253_v48 }
  0x1c   :  { %v69_v53 = vsel %vm67_vm5, %v68_v52, %v256_v50 }
  0x1d   :  { %v70_v54 = vadd.s32 %v69_v53, %v65_v51 }
  0x1f   :  { %v71_v55 = vadd.s32 536870912, %v70_v54 }
  0x21   :  { %v72_v56 = vshrl.u32 %v71_v55, 30 }
  0x23   :  { %v73_v57 = vshll.u32 %v72_v56, 30  ;;  %v96_v13 = vsub.s32 4, %v72_v56 }
  0x25   :  { %v74_v58 = vsub.s32 %v70_v54, %v73_v57  ;;  %v97_v16 = vsel %vm12_vm7, %v96_v13, %v72_v56 }
  0x26   :  { %v99_v19 = vsel %vm11_vm8, 0, %v97_v16 }
  0x27   :  { %v76_v59 = vsub.s32 0, %v74_v58  ;;  %v103_v20 = vadd.s32 3, %v99_v19 }
  0x29   :  { %v174_v60 = vmin.u32 %v76_v59, %v74_v58  ;;  %v104_v21 = vand.u32 3, %v103_v20 }
  0x2b   :  { %v78_v61 = vclz %v174_v60  ;;  %vm109_vm9 = vcmp.eq.s32.totalorder %v104_v21, 2  ;;  %vm106_vm10 = vcmp.eq.s32.totalorder %v104_v21, 0  ;;  %vm105_vm11 = vcmp.lt.s32.totalorder %v104_v21, 2 }
  0x2d   :  { %v175_v62 = vadd.s32 4294967294, %v78_v61 }
  0x2f   :  { %vm176_vm6 = vcmp.lt.s32.totalorder %v175_v62, 0 }
  0x30   :  { %v81_v1 = vsel %vm176_vm6, 0, %v175_v62 }
  0x31   :  { %v82_v2 = vsub.s32 32, %v81_v1  ;;  %v83_v4 = vshll.u32 %v74_v58, %v81_v1  ;;  %v86_v5 = vsub.s32 4294967266, %v81_v1 }
  0x33   :  { %v84_v6 = vshrl.u32 %v66_v63, %v82_v2  ;;  %v87_v7 = vadd.s32 127, %v86_v5 }
  0x35   :  { %v85_v8 = vor.u32 %v84_v6, %v83_v4  ;;  %v88_v9 = vshll.u32 %v87_v7, 23 }
  0x37   :  { %v89_v10 = vor.u32 4788187, %v88_v9  ;;  %v92_v11 = vcvt.s32.f32 %v85_v8 }
  0x39   :  { %v90_v12 = vand.u32 2147483647, %v89_v10 }
  0x3b   :  { %v93_v14 = vmul.f32 %v92_v11, %v90_v12 }
  0x3d   :  { %v94_v15 = vxor.u32 2147483648, %v93_v14 }
  0x3f   :  { %v95_v17 = vsel %vm12_vm7, %v94_v15, %v93_v14 }
  0x40   :  { %v98_v18 = vsel %vm11_vm8, %v246_v0, %v95_v17 }
  0x41   :  { %192 = vcosq.f32 %v98_v18 }
  0x42   :  { %194 = vsinq.f32 %v98_v18 }
  0x4b   :  { %v193_v22 = vpop.eup %192 }
  0x4c   :  { %v195_v23 = vpop.eup %194  ;;  %v110_v24 = vxor.u32 2147483648, %v193_v22 }
  0x4d   :  { %v107_v25 = vxor.u32 2147483648, %v195_v23 }
  0x4e   :  { %v111_v3 = vsel %vm109_vm9, %v110_v24, %v195_v23 }
  0x4f   :  { %v108_v26 = vsel %vm106_vm10, %v193_v22, %v107_v25 }
  0x50   :  { %v112_v27 = vsel %vm105_vm11, %v108_v26, %v111_v3 }
  0x51   :  { %v113_v28 = vsel %vm102_vm12, nan, %v112_v27 }
  0x52   :  { %v114_v29 = vsub.f32 1.0, %v113_v28  ;;  %v116_v39 = vadd.f32 1.0, %v113_v28 }
  0x54   :  { %v115_v30 = vmul.f32 0.5, %v114_v29  ;;  %v117_v41 = vmul.f32 0.5, %v116_v39 }
  0x56   :  { %119 = vrot.lane.b32.xlu0 %v115_v30, %s228_s0 }
  0x5a   :  { %123 = vrot.lane.b32.xlu0 %v115_v30, %s229_s8 }
  0xc8   :  { %v120_v34 = vpop.permute.xlu0 %119 }
  0xc9   :  { %v122_v35 = vmul.f32 %v120_v34, %v115_v30 }
  0xcb   :  { %v131_v36 = vrot.slane %v122_v35, %v130_v33 }
  0xcc   :  { %v124_v37 = vpop.permute.xlu0 %123 }
  0xcd   :  { %v126_v38 = vmul.f32 %v124_v37, %v115_v30  ;;  %143 = vrot.lane.b32.xlu0 %v131_v36, %s230_s9  ;;  %132 = vrot.lane.b32.xlu1 %v131_v36, %s228_s0 }
  0xcf   :  { %v139_v0 = vrot.slane %v126_v38, %v130_v33 }
  0xd1   :  { %140 = vrot.lane.b32.xlu1 %v139_v0, %s231_s10 }
 0x13f   :  { %v133_v40 = vpop.permute.xlu1 %132  ;;  %v144_v43 = vpop.permute.xlu0 %143 }
 0x143   :  { %v141_v42 = vpop.permute.xlu1 %140 }
 0x144   :  { %v147_v44 = vsel %vm146_vm13, %v133_v40, %v141_v42 }
 0x145   :  { %v149_v45 = vsel %vm148_vm14, %v147_v44, %v144_v43 }
 0x146   :  { %v150_v46 = vmul.f32 %v149_v45, %v117_v41 }
 0x148   :  { %v152_v47 = vsel %vm151_vm15, %v150_v46, 0.0 }
 0x149   :  { %153 = vadd.xlane.f32.xlu1 %v152_v47 }
 0x1d6   :  { %v154_v48 = vpop.xlane.xlu1 %153 }
 0x1d7   :  { %v155_v49 = vmax.f32 %v154_v48, 1e-30 }
 0x1d9   :  { %196 = vrcp.f32 %v155_v49 }
 0x1e3   :  { %v197_v50 = vpop.eup %196 }
 0x1e4   :  { %v157_v51 = vmul.f32 %v197_v50, %v150_v46 }
 0x1e6   :  { %158 = vst.msk [vmem:[#allocation2] sm:$0x1] %vm151_vm15, %v157_v51 }
 0x1e7   :  { %209 = shalt.err (!%p206_p4)
}
 0x1e8   :  { %s210_s17 = scalar_lea.hbm %s280_s1, 16 }
 0x1e9   :  { %p211_p5 = scmp.ne.s32.totalorder %s280_s1, %s210_s17  ;;  %p214_p6 = scmp.lt.u32.totalorder %s210_s17, %s280_s1 }
 0x1eb   :  { %p216_p7 = pnand %p214_p6, %p211_p5 }
 0x1ed   :  { %219 = shalt.err (!%p216_p7)
}
 0x1ee   :  { %168 = dma.vmem_to_hbm [thread:$0]  %s166_s12, 16, %s280_s1, [#allocation3]  }
 0x1ef   :  { %220 = dma.done.wait [#allocation3], 16  }
 0x1f0   :  { %221 = vsyncadd [#allocation3], 4294967280 }
 0x1f1   :  { %172 = vsyncpa [#allocation3], 1 }

</bundles_post_ra>
